<compile_context>
chip_gen: v7x
topology: tpu7x:2x2x1
jax: 0.10.0
libtpu: 0.0.40
codegen_flags: <defaults>
</compile_context>

<pallas_src>
import jax
import jax.numpy as jnp
from jax.experimental import pallas as pl
from jax.experimental.pallas import tpu as pltpu


def _a2_kernel(x_ref, w1_ref, b1_ref, m2_ref, b23_ref, w4_ref, b4_ref, o_ref):
    x = x_ref[...]  # [tr, G*dim_in_p]   (G packed samples per row)

    # encoder Linear(dim_in,2) + Tanh, block-diagonal over the G packed samples
    # (DEFAULT matmul precision: one bf16 MXU pass, f32 accumulation)
    h = jnp.tanh(
        jnp.dot(x, w1_ref[...], preferred_element_type=jnp.float32) + b1_ref[...])

    # encoder Linear(2,1) and decoder Linear(1,2) + Tanh folded into one tiny
    # matmul: per-sample block of M2 = outer(w2, w3), B23 = b2*w3 + b3
    d = jnp.tanh(
        jnp.dot(h, m2_ref[...], preferred_element_type=jnp.float32) + b23_ref[...])

    # decoder Linear(2,dim_out), block-diagonal over the G packed samples
    # (tanh on the narrow [tr,2G] intermediates is left on the EUP; only worth
    #  restructuring if profiling shows it co-binding on v7x)
    y = jnp.dot(d, w4_ref[...], preferred_element_type=jnp.float32) + b4_ref[...]

    o_ref[...] = y.astype(o_ref.dtype)


def _vmem_plan():
    """(vmem_limit_bytes, default tile_rows) chosen per TPU generation."""
    try:
        cap = pltpu.get_tpu_info().vmem_capacity_bytes
    except Exception:  # pragma: no cover - conservative fallback
        cap = None
    if cap is not None and cap > 64 * 1024 * 1024:      # v5e / v6e: 128 MiB physical
        return 64 * 1024 * 1024, 16384
    # v7x-class (64 MiB per TC) or unknown: keep headroom under the ceiling
    return 48 * 1024 * 1024, 8192


def _dense_ref(x, w1, b1, w2, b2, w3, b3, w4, b4):
    h = jnp.tanh(x @ w1 + b1)
    z = h @ w2 + b2
    d = jnp.tanh(z @ w3 + b3)
    return d @ w4 + b4


def a2_reconstructor(temporal_x, params, *, tile_rows=None):
    """temporal_x: [B, dim_in] float32. params: dict (w[in,out], b[1,out])."""
    f32 = jnp.float32
    B, dim_in = temporal_x.shape
    w1, b1 = params["w1"].astype(f32), params["b1"].astype(f32)   # [dim_in,2],[1,2]
    w2, b2 = params["w2"].astype(f32), params["b2"].astype(f32)   # [2,1],    [1,1]
    w3, b3 = params["w3"].astype(f32), params["b3"].astype(f32)   # [1,2],    [1,2]
    w4, b4 = params["w4"].astype(f32), params["b4"].astype(f32)   # [2,dim_out],[1,dim_out]
    dim_out = w4.shape[1]

    # ---- lane-dense packing: G samples per 128-wide packed row --------------
    if dim_in <= 128:
        dim_in_p = 1
        while dim_in_p < dim_in:
            dim_in_p *= 2                     # next power of two -> divides 128
        G = 128 // dim_in_p
    else:
        dim_in_p, G = dim_in, 1               # TODO(synk): dim_in > 128 stays unpacked

    B_main = (B // G) * G                     # rows handled by the Pallas kernel
    rem = B - B_main                          # <= G-1 rows -> tiny plain-JAX epilogue

    if B_main == 0:                           # degenerate tiny batch
        return _dense_ref(temporal_x.astype(f32), w1, b1, w2, b2, w3, b3, w4, b4)

    # ---- one-time weight preparation (tiny, plain JAX) ----------------------
    if dim_in_p != dim_in:
        w1p = jnp.concatenate([w1, jnp.zeros((dim_in_p - dim_in, 2), f32)], axis=0)
    else:
        w1p = w1
    eye = jnp.eye(G, dtype=f32)
    W1 = jnp.kron(eye, w1p)                                   # [G*dim_in_p, 2G]
    B1 = jnp.tile(b1, (1, G))                                 # [1, 2G]
    w3t = jnp.tile(w3, (1, G))                                # [1, 2G]
    M2 = jnp.kron(eye, w2 @ jnp.ones((1, 2), f32)) * w3t      # [2G, 2G]
    B23 = b2[0, 0] * w3t + jnp.tile(b3, (1, G))               # [1, 2G]
    W4 = jnp.kron(eye, w4)                                    # [2G, G*dim_out]
    B4 = jnp.tile(b4, (1, G))                                 # [1, G*dim_out]

    # ---- pack G samples per row (row-major reshape: no HBM copy) ------------
    x_main = temporal_x[:B_main].astype(f32)
    if dim_in_p != dim_in:
        # one-time zero-column pad so the packed row stays 128-lane dense
        x_main = jnp.pad(x_main, ((0, 0), (0, dim_in_p - dim_in)))
    Bp = B_main // G
    L_in, L_out = G * dim_in_p, G * dim_out
    xp = x_main.reshape(Bp, L_in)

    # ---- tile sizing: big tiles, per-generation VMEM cap, >=4 grid steps ----
    vmem_limit, default_tile = _vmem_plan()
    if tile_rows is None:
        tile_rows = default_tile
    bytes_per_row = 4 * (L_in + 2 * L_out)          # in + out + f32 temp, per row
    tr_budget = max(8, int((vmem_limit // 2) // (2 * bytes_per_row)) // 8 * 8)
    bp_rounded = max(8, -(-Bp // 8) * 8)
    tr = min(tile_rows, tr_budget, bp_rounded)
    min_steps = 4                                   # pipelining + v7x megacore split
    if Bp >= 2 * 8:
        tr = min(tr, max(8, (Bp // min_steps) // 8 * 8))
    tr = max(8, (tr // 8) * 8)
    grid = (pl.cdiv(Bp, tr),)

    def const_spec(a):
        return pl.BlockSpec(a.shape, lambda i: (0, 0))

    out_main = pl.pallas_call(
        _a2_kernel,
        out_shape=jax.ShapeDtypeStruct((Bp, L_out), f32),
        grid=grid,
        in_specs=[pl.BlockSpec((tr, L_in), lambda i: (i, 0)),
                  const_spec(W1), const_spec(B1),
                  const_spec(M2), const_spec(B23),
                  const_spec(W4), const_spec(B4)],
        out_specs=pl.BlockSpec((tr, L_out), lambda i: (i, 0)),
        compiler_params=pltpu.CompilerParams(
            dimension_semantics=("parallel",),
            vmem_limit_bytes=vmem_limit),
    )(xp, W1, B1, M2, B23, W4, B4)

    out_main = out_main.reshape(B_main, dim_out)    # free row-major reshape

    if rem == 0:
        return out_main                              # zero-copy fast path

    y_tail = _dense_ref(temporal_x[B_main:].astype(f32),
                        w1, b1, w2, b2, w3, b3, w4, b4)
    return jnp.concatenate([out_main, y_tail], axis=0)


def init_params(key, t_nc, window, c_in):
    """Deterministic init mimicking nn.Linear's U(-1/sqrt(fan_in), 1/sqrt(fan_in)).
    Weights stored [in, out] (transposed vs PyTorch's [out, in]); biases [1, out]."""
    dim_in = int(c_in * window)
    dim_out = int(t_nc * window)

    def linear(key, fan_in, fan_out):
        kw, kb = jax.random.split(key)
        bound = 1.0 / jnp.sqrt(jnp.float32(fan_in))
        w = jax.random.uniform(kw, (fan_in, fan_out), jnp.float32, -bound, bound)
        b = jax.random.uniform(kb, (1, fan_out), jnp.float32, -bound, bound)
        return w, b

    k1, k2, k3, k4 = jax.random.split(key, 4)
    w1, b1 = linear(k1, dim_in, 2)
    w2, b2 = linear(k2, 2, 1)
    w3, b3 = linear(k3, 1, 2)
    w4, b4 = linear(k4, 2, dim_out)
    return {"w1": w1, "b1": b1, "w2": w2, "b2": b2,
            "w3": w3, "b3": b3, "w4": w4, "b4": b4}


if __name__ == "__main__":
    # small shapes: t_nc=4, window=8, c_in=4  ->  dim_in=32, dim_out=32, G=4
    t_nc, window, c_in = 4, 8, 4
    B = 256                        # -> 64 packed rows -> 4-step pipelined grid
    dim_in = c_in * window

    key = jax.random.PRNGKey(0)
    k_params, k_x = jax.random.split(key)
    params = init_params(k_params, t_nc, window, c_in)
    temporal_x = jax.random.normal(k_x, (B, dim_in), jnp.float32)

    run = jax.jit(a2_reconstructor)
    x_rec = run(temporal_x, params)
    jax.block_until_ready(x_rec)

    # fp32 reference (HIGHEST precision) matching PyTorch's fp32 Linear math
    hi = jax.lax.Precision.HIGHEST
    h = jnp.tanh(jnp.dot(temporal_x, params["w1"], precision=hi) + params["b1"])
    z = jnp.dot(h, params["w2"], precision=hi) + params["b2"]
    d = jnp.tanh(jnp.dot(z, params["w3"], precision=hi) + params["b3"])
    ref = jnp.dot(d, params["w4"], precision=hi) + params["b4"]

    assert x_rec.shape == (B, t_nc * window), x_rec.shape
    # DEFAULT-precision (single bf16 pass) matmuls on tanh-bounded O(1) values:
    # typical max abs error ~5e-3; 2e-2 is a safe hard bound.
    err = float(jnp.max(jnp.abs(x_rec - ref)))
    assert err < 2e-2, f"mismatch vs reference (max abs err {err})"

    print("KERNEL_OK")
</pallas_src>

<mosaic_0001>
module attributes {stable_mosaic.version = 11 : i64} {
  func.func @_a2_kernel(%arg0: i32, %arg1: memref<16x128xf32, #tpu.memory_space<vmem>>, %arg2: memref<128x8xf32, #tpu.memory_space<vmem>>, %arg3: memref<1x8xf32, #tpu.memory_space<vmem>>, %arg4: memref<8x8xf32, #tpu.memory_space<vmem>>, %arg5: memref<1x8xf32, #tpu.memory_space<vmem>>, %arg6: memref<8x128xf32, #tpu.memory_space<vmem>>, %arg7: memref<1x128xf32, #tpu.memory_space<vmem>>, %arg8: memref<16x128xf32, #tpu.memory_space<vmem>>) attributes {dimension_semantics = [#tpu.dimension_semantics<parallel>], iteration_bounds = array<i64: 4>, scalar_prefetch = 0 : i64, scratch_operands = 0 : i64, tpu.core_type = #tpu.core_type<tc>, window_params = [{transform_indices = @transform_0, window_bounds = array<i64: 16, 128>}, {pipeline_mode = #tpu.pipeline_mode<synchronous>, transform_indices = @transform_1, window_bounds = array<i64: 128, 8>}, {pipeline_mode = #tpu.pipeline_mode<synchronous>, transform_indices = @transform_2, window_bounds = array<i64: 1, 8>}, {pipeline_mode = #tpu.pipeline_mode<synchronous>, transform_indices = @transform_3, window_bounds = array<i64: 8, 8>}, {pipeline_mode = #tpu.pipeline_mode<synchronous>, transform_indices = @transform_4, window_bounds = array<i64: 1, 8>}, {pipeline_mode = #tpu.pipeline_mode<synchronous>, transform_indices = @transform_5, window_bounds = array<i64: 8, 128>}, {pipeline_mode = #tpu.pipeline_mode<synchronous>, transform_indices = @transform_6, window_bounds = array<i64: 1, 128>}, {transform_indices = @transform_7, window_bounds = array<i64: 16, 128>}]} {
    %c0 = arith.constant 0 : index
    %c0_0 = arith.constant 0 : index
    %0 = vector.load %arg1[%c0, %c0_0] : memref<16x128xf32, #tpu.memory_space<vmem>>, vector<16x128xf32>
    %c0_1 = arith.constant 0 : index
    %c0_2 = arith.constant 0 : index
    %1 = vector.load %arg2[%c0_1, %c0_2] : memref<128x8xf32, #tpu.memory_space<vmem>>, vector<128x8xf32>
    %cst = arith.constant dense<0.000000e+00> : vector<16x8xf32>
    %2 = tpu.matmul %0, %1, %cst {dimension_numbers = #tpu.dot_dimension_numbers<[1], [0], [0], [1], [0, 0, 1, 1], [], []>} : vector<16x128xf32>, vector<128x8xf32>, vector<16x8xf32> -> vector<16x8xf32>
    %c0_3 = arith.constant 0 : index
    %c0_4 = arith.constant 0 : index
    %3 = vector.load %arg3[%c0_3, %c0_4] : memref<1x8xf32, #tpu.memory_space<vmem>>, vector<1x8xf32>
    %4 = vector.broadcast %3 : vector<1x8xf32> to vector<16x8xf32>
    %5 = arith.addf %2, %4 : vector<16x8xf32>
    %6 = math.tanh %5 : vector<16x8xf32>
    %c0_5 = arith.constant 0 : index
    %c0_6 = arith.constant 0 : index
    %7 = vector.load %arg4[%c0_5, %c0_6] : memref<8x8xf32, #tpu.memory_space<vmem>>, vector<8x8xf32>
    %cst_7 = arith.constant dense<0.000000e+00> : vector<16x8xf32>
    %8 = tpu.matmul %6, %7, %cst_7 {dimension_numbers = #tpu.dot_dimension_numbers<[1], [0], [0], [1], [0, 0, 1, 1], [], []>} : vector<16x8xf32>, vector<8x8xf32>, vector<16x8xf32> -> vector<16x8xf32>
    %c0_8 = arith.constant 0 : index
    %c0_9 = arith.constant 0 : index
    %9 = vector.load %arg5[%c0_8, %c0_9] : memref<1x8xf32, #tpu.memory_space<vmem>>, vector<1x8xf32>
    %10 = vector.broadcast %9 : vector<1x8xf32> to vector<16x8xf32>
    %11 = arith.addf %8, %10 : vector<16x8xf32>
    %12 = math.tanh %11 : vector<16x8xf32>
    %c0_10 = arith.constant 0 : index
    %c0_11 = arith.constant 0 : index
    %13 = vector.load %arg6[%c0_10, %c0_11] : memref<8x128xf32, #tpu.memory_space<vmem>>, vector<8x128xf32>
    %cst_12 = arith.constant dense<0.000000e+00> : vector<16x128xf32>
    %14 = tpu.matmul %12, %13, %cst_12 {dimension_numbers = #tpu.dot_dimension_numbers<[1], [0], [0], [1], [0, 0, 1, 1], [], []>} : vector<16x8xf32>, vector<8x128xf32>, vector<16x128xf32> -> vector<16x128xf32>
    %c0_13 = arith.constant 0 : index
    %c0_14 = arith.constant 0 : index
    %15 = vector.load %arg7[%c0_13, %c0_14] : memref<1x128xf32, #tpu.memory_space<vmem>>, vector<1x128xf32>
    %16 = vector.broadcast %15 : vector<1x128xf32> to vector<16x128xf32>
    %17 = arith.addf %14, %16 : vector<16x128xf32>
    %c0_15 = arith.constant 0 : index
    %c0_16 = arith.constant 0 : index
    %18 = vector.load %arg8[%c0_15, %c0_16] : memref<16x128xf32, #tpu.memory_space<vmem>>, vector<16x128xf32>
    tpu.vector_store %arg8[%c0_15, %c0_16], %17 {strides = array<i32>} : memref<16x128xf32, #tpu.memory_space<vmem>>, vector<16x128xf32>,
    return
  }
  func.func @transform_0(%arg0: i32) -> (i32, i32) {
    %c0_i32 = arith.constant 0 : i32
    %c0_i32_0 = arith.constant 0 : i32
    return %arg0, %c0_i32 : i32, i32
  }
  func.func @transform_1(%arg0: i32) -> (i32, i32) {
    %c0_i32 = arith.constant 0 : i32
    %c0_i32_0 = arith.constant 0 : i32
    %c0_i32_1 = arith.constant 0 : i32
    return %c0_i32, %c0_i32_0 : i32, i32
  }
  func.func @transform_2(%arg0: i32) -> (i32, i32) {
    %c0_i32 = arith.constant 0 : i32
    %c0_i32_0 = arith.constant 0 : i32
    %c0_i32_1 = arith.constant 0 : i32
    return %c0_i32, %c0_i32_0 : i32, i32
  }
  func.func @transform_3(%arg0: i32) -> (i32, i32) {
    %c0_i32 = arith.constant 0 : i32
    %c0_i32_0 = arith.constant 0 : i32
    %c0_i32_1 = arith.constant 0 : i32
    return %c0_i32, %c0_i32_0 : i32, i32
  }
  func.func @transform_4(%arg0: i32) -> (i32, i32) {
    %c0_i32 = arith.constant 0 : i32
    %c0_i32_0 = arith.constant 0 : i32
    %c0_i32_1 = arith.constant 0 : i32
    return %c0_i32, %c0_i32_0 : i32, i32
  }
  func.func @transform_5(%arg0: i32) -> (i32, i32) {
    %c0_i32 = arith.constant 0 : i32
    %c0_i32_0 = arith.constant 0 : i32
    %c0_i32_1 = arith.constant 0 : i32
    return %c0_i32, %c0_i32_0 : i32, i32
  }
  func.func @transform_6(%arg0: i32) -> (i32, i32) {
    %c0_i32 = arith.constant 0 : i32
    %c0_i32_0 = arith.constant 0 : i32
    %c0_i32_1 = arith.constant 0 : i32
    return %c0_i32, %c0_i32_0 : i32, i32
  }
  func.func @transform_7(%arg0: i32) -> (i32, i32) {
    %c0_i32 = arith.constant 0 : i32
    %c0_i32_0 = arith.constant 0 : i32
    return %arg0, %c0_i32 : i32, i32
  }
}

</mosaic_0001>

<bundles_post_ra>
// kernel: a2_reconstructor.1
= control target key start
LH: loop header
LB: loop body
LE: loop exit
PB: predicated region body
PF: predicated region fallthrough
CT: control target
= control target key end

     0   :  { %s806_s24 = smov 0   ;;  %s897_s0 = inlined_call_operand.vmem [shape: f32[64,128], index: 0, kind: input, shape index: {}]   ;;  %s898_s1 = inlined_call_operand.vmem [shape: f32[128,8], index: 1, kind: input, shape index: {}]   ;;  %s899_s2 = inlined_call_operand.vmem [shape: f32[1,8], index: 2, kind: input, shape index: {}]   ;;  %s900_s3 = inlined_call_operand.vmem [shape: f32[8,8], index: 3, kind: input, shape index: {}]   ;;  %s901_s4 = inlined_call_operand.vmem [shape: f32[1,8], index: 4, kind: input, shape index: {}]   ;;  %s902_s5 = inlined_call_operand.vmem [shape: f32[8,128], index: 5, kind: input, shape index: {}]   ;;  %s903_s6 = inlined_call_operand.vmem [shape: f32[1,128], index: 6, kind: input, shape index: {}]   ;;  %s904_s7 = inlined_call_operand.vmem [shape: f32[64,128], index: 7, kind: output, shape index: {}]  }
   0x1 LB: > { %s623_s25 = sadd.s32 4294967295, %s764_s24   ;;  %p627_p0 = scmp.ge.s32.totalorder %s764_s24, 1  ;;  %s764_s24 = sphi %s806_s24, %s17_s24  }
   0x2   : > { %p238_p1 = scmp.lt.s32.totalorder %s764_s24, 5 }
   0x4   : > { %p239_p2 = pnand %p627_p0, %p238_p1 }
   0x5   : > { %v284_v0 = vld [vmem:[%s898_s1] sm:$0xff] (!%p239_p2)  ;;  %v285_v1 = vld [vmem:[%s898_s1 + $0x8] sm:$0xff] (!%p239_p2)  ;;  %v286_v2 = vld [vmem:[%s898_s1 + $0x10] sm:$0xff] (!%p239_p2)  ;;  %s628_s9 = sshll.u32 (!%p239_p2), %s623_s25, 1  ;;  %vm392_vm0 = vcmask (!%p239_p2), 64512  }
   0x6   : > { %242 = sbr.rel (%p239_p2) target bundleno = 710 (0x2c6), region = 48  ;;  %v710_v3 = vpack.c.bf16 (!%p239_p2), %v285_v1, %v284_v0  ;;  %v287_v4 = vld [vmem:[%s898_s1 + $0x18] sm:$0xff] (!%p239_p2)  ;;  %p271_p3 = scmp.lt.s32.totalorder (!%p239_p2), %s628_s9, 7  ;;  %v288_v6 = vld [vmem:[%s898_s1 + $0x20] sm:$0xff] (!%p239_p2)  ;;  %v289_v7 = vld [vmem:[%s898_s1 + $0x28] sm:$0xff] (!%p239_p2) }
   0x7   : > { %v714_v5 = vpack.c.bf16 (!%p239_p2), %v287_v4, %v286_v2  ;;  %v718_v8 = vpack.c.bf16 (!%p239_p2), %v289_v7, %v288_v6  ;;  %v290_v9 = vld [vmem:[%s898_s1 + $0x30] sm:$0xff] (!%p239_p2)  ;;  %v291_v10 = vld [vmem:[%s898_s1 + $0x38] sm:$0xff] (!%p239_p2)  ;;  %v292_v13 = vld [vmem:[%s898_s1 + $0x40] sm:$0xff] (!%p239_p2) }
   0x8   : > { %711 = vmatprep.subr.bf16.mxu0 (!%p239_p2), %v710_v3  ;;  %v722_v12 = vpack.c.bf16 (!%p239_p2), %v291_v10, %v290_v9  ;;  %v293_v14 = vld [vmem:[%s898_s1 + $0x48] sm:$0xff] (!%p239_p2)  ;;  %v294_v16 = vld [vmem:[%s898_s1 + $0x50] sm:$0xff] (!%p239_p2)  ;;  %v295_v17 = vld [vmem:[%s898_s1 + $0x58] sm:$0xff] (!%p239_p2) }
   0x9   : > { %713 = vmatpush3.bf16.msra.mxu0 (!%p239_p2), %v710_v3  ;;  %v726_v15 = vpack.c.bf16 (!%p239_p2), %v293_v14, %v292_v13  ;;  %v730_v18 = vpack.c.bf16 (!%p239_p2), %v295_v17, %v294_v16  ;;  %v296_v19 = vld [vmem:[%s898_s1 + $0x60] sm:$0xff] (!%p239_p2)  ;;  %v297_v20 = vld [vmem:[%s898_s1 + $0x68] sm:$0xff] (!%p239_p2)  ;;  %v298_v22 = vld [vmem:[%s898_s1 + $0x70] sm:$0xff] (!%p239_p2) }
   0xa   : > { %715 = vmatprep.subr.bf16.mxu0 (!%p239_p2), %v714_v5  ;;  %v734_v21 = vpack.c.bf16 (!%p239_p2), %v297_v20, %v296_v19  ;;  %v299_v23 = vld [vmem:[%s898_s1 + $0x78] sm:$0xff] (!%p239_p2)  ;;  %v384_v26 = vld [vmem:[%s900_s3] sm:$0xff] (!%p239_p2) }
   0xb   : > { %v738_v24 = vpack.c.bf16 (!%p239_p2), %v299_v23, %v298_v22  ;;  %700 = vmatprep.subr.mxu1 (!%p239_p2), %v384_v26  ;;  %v632_v27 = vld [vmem:[%s899_s2] ss:$0 sm:$0xff] (!%p239_p2) }
   0xc   : > { %701 = vmatpush3.msra.mxu1 (!%p239_p2), %v384_v26  ;;  %v476_v34 = vld [vmem:[%s902_s5] sm:$0xff] (!%p239_p2) }
   0xd   : > { %s906_s9 = smov (!%p271_p3, %s628_s9), 7  ;;  %717 = vmatpush3.bf16.msra.mxu0 %v714_v5  ;;  %705 = vmatprep.subr.mxu1 %v476_v34  ;;  %v633_v35 = vld [vmem:[%s901_s4] ss:$0 sm:$0xff] }
   0xe   : > { %s629_s16 = sshll.u32 %s906_s9, 3  ;;  %719 = vmatprep.subr.bf16.mxu0 %v718_v8  ;;  %v636_v42 = vld [vmem:[%s903_s6] ss:$0 sm:$0xff] }
   0xf   : > { %s274_s23 = scalar_lea.vmem %s897_s0, %s629_s16  ;;  %s280_s11 = scalar_lea.vmem %s904_s7, %s629_s16 }
  0x10   : > { %v282_v11 = vld [vmem:[%s274_s23] sm:$0xff]  ;;  %v283_v25 = vld [vmem:[%s274_s23 + $0x8] sm:$0xff] }
  0x11   : > { %697 = vmatprep.mubr.f32.mxu0 %v282_v11  ;;  %721 = vmatpush3.bf16.msra.mxu0 %v718_v8 }
  0x12   : > { %723 = vmatprep.subr.bf16.mxu0 %v722_v12 }
  0x15   : > { %725 = vmatpush3.bf16.msra.mxu0 %v722_v12 }
  0x16   : > { %727 = vmatprep.subr.bf16.mxu0 %v726_v15 }
  0x19   : > { %729 = vmatpush3.bf16.msra.mxu0 %v726_v15 }
  0x1a   : > { %731 = vmatprep.subr.bf16.mxu0 %v730_v18 }
  0x1d   : > { %733 = vmatpush3.bf16.msra.mxu0 %v730_v18 }
  0x1e   : > { %735 = vmatprep.subr.bf16.mxu0 %v734_v21 }
  0x21   : > { %737 = vmatpush3.bf16.msra.mxu0 %v734_v21 }
  0x22   : > { %739 = vmatprep.subr.bf16.mxu0 %v738_v24 }
  0x25   : > { %741 = vmatpush3.bf16.msra.mxu0 %v738_v24 }
  0x28   : > { %698 = vmatmul.mubr.f32.vlgmr.msra.gmra.mrb[0].mxu0 %v283_v25 }
  0xfb   : > { %v699_v28 = vpop.f32.mrb[0].mxu0 }
  0xfc   : > { %v379_v29 = vadd.f32 %v699_v28, %v632_v27  ;;  %v373_v30 = vpop.f32.mrb[1].mxu0 }
  0xfd   : > { %v374_v31 = vadd.f32 %v632_v27, %v373_v30 }
  0xff   : > { %750 = vtanh.f32 %v374_v31 }
 0x100   : > { %752 = vtanh.f32 %v379_v29 }
 0x109   : > { %v751_v32 = vpop.eup %750 }
 0x10a   : > { %v753_v33 = vpop.eup %752  ;;  %702 = vmatprep.mubr.msk.f32.mxu1 %vm392_vm0, %v751_v32 }
 0x10b   : > { %703 = vmatmul.mubr.msk.f32.vlgmr.msra.gmra.mrb[0].mxu1 %vm392_vm0, %v753_v33 }
 0x10c   : > { %706 = vmatpush3.msra.mxu1 %v476_v34 }
 0x1de   : > { %v704_v36 = vpop.f32.mrb[0].mxu1 }
 0x1df   : > { %v471_v37 = vadd.f32 %v704_v36, %v633_v35  ;;  %v465_v38 = vpop.f32.mrb[1].mxu1 }
 0x1e0   : > { %v466_v39 = vadd.f32 %v633_v35, %v465_v38 }
 0x1e2   : > { %754 = vtanh.f32 %v466_v39 }
 0x1e3   : > { %756 = vtanh.f32 %v471_v37 }
 0x1ec   : > { %v755_v40 = vpop.eup %754 }
 0x1ed   : > { %v757_v41 = vpop.eup %756  ;;  %707 = vmatprep.mubr.msk.f32.mxu1 %vm392_vm0, %v755_v40 }
 0x1ee   : > { %708 = vmatmul.mubr.msk.f32.vlgmr.msra.gmra.mrb[2].mxu1 %vm392_vm0, %v757_v41 }
 0x2c1   : > { %v709_v43 = vpop.f32.mrb[2].mxu1 }
 0x2c2   : > { %v556_v44 = vpop.f32.mrb[3].mxu1  ;;  %v562_v46 = vadd.f32 %v709_v43, %v636_v42 }
 0x2c3   : > { %v557_v45 = vadd.f32 %v636_v42, %v556_v44 }
 0x2c4   : > { %566 = vst [vmem:[%s280_s11 + $0x8] sm:$0xff] %v562_v46 }
 0x2c5   : > { %565 = vst [vmem:[%s280_s11] sm:$0xff] %v557_v45 }
 0x2c6 PF: > { %s17_s24 = sadd.s32 1, %s764_s24  }
 0x2c7   : > { %p14_p4 = scmp.ge.s32.totalorder %s17_s24, 6  }
 0x2c9   :  { %16 = sbr.rel (!%p14_p4) target bundleno = 1 (0x1), region = 78 }

</bundles_post_ra>
